<compile_context>
chip_gen: v7x
topology: tpu7x:2x2x1
jax: 0.10.0
libtpu: 0.0.40
codegen_flags: <defaults>
</compile_context>

<pallas_src>
import math

import jax
import jax.numpy as jnp
from jax import lax
from jax.experimental import pallas as pl
from jax.experimental.pallas import tpu as pltpu

# TODO(synk): RNNEncoder, Controller, GraphR (updater) and Matching are not
# defined in the reference source; CR.forward cannot be completed end-to-end.


def _round_up(x, m):
    return ((x + m - 1) // m) * m


def _ceil_div(a, b):
    return (a + b - 1) // b


# ---------------------------------------------------------------------------
# Kernel 1: LocationEncoder (packed: R boxes per 128-lane row)
#   xn = x / max(||x||_2, 1e-12) * scale ;  out = xn @ W + b
#   scale is folded into W; W/b are pre-packed block-diagonally in the wrapper.
# ---------------------------------------------------------------------------
def _locate_encoder_kernel(xp_ref, ssum_ref, wblk_ref, bblk_ref, out_ref):
    x = xp_ref[...]                                            # (tg, R*F)
    # Per-box sum of squares, broadcast back to that box's F lanes via the
    # block-diagonal ones matrix (exact).
    nrm2 = jnp.dot(x * x, ssum_ref[...], preferred_element_type=jnp.float32)
    inv = lax.rsqrt(jnp.maximum(nrm2, 1e-24))                  # == 1/max(||x||,1e-12)
    xn = x * inv
    out_ref[...] = (
        jnp.dot(xn, wblk_ref[...], preferred_element_type=jnp.float32)
        + bblk_ref[...]
    )                                                          # (tg, R*D) lane-dense


def locate_encoder(lfeat, scale, W, b, *, tm=4096):
    B, N, F = lfeat.shape
    D = W.shape[1]
    M = B * N

    # Boxes packed per 128-lane row: minimal R makes R*D a multiple of 128;
    # pack a few extra boxes (<=16, <=128 input lanes, tiny weights) so the
    # input stream and the MXU K dim are less lane-starved.
    R = 128 // math.gcd(128, D)
    while (R < 16 and (2 * R) * F <= 128
           and (2 * R) * (2 * R) * F * D * 4 <= (1 << 20)):
        R *= 2

    gran = 8 * R                          # rows per packed sublane-tile
    M_pad = _round_up(M, gran)            # pad only to granularity (NOT to tm)
    G = M_pad // R                        # packed rows (multiple of 8)

    x = lfeat.reshape(M, F).astype(jnp.float32)
    if M_pad != M:
        x = jnp.pad(x, ((0, M_pad - M), (0, 0)))   # <gran zero rows, sliced off below
    xp = x.reshape(G, R * F)                        # free row-major view

    # Row tile in packed rows; multiple of 8, <= G, and capped so the parallel
    # grid has >= 2 steps when possible (v7x: 2 TensorCores).
    tg = max(8, (min(tm // R, G) // 8) * 8)
    tg = min(tg, max(8, _round_up(_ceil_div(G, 2), 8)))
    grid = _ceil_div(G, tg)               # ragged last block masked by Pallas

    # One-time constant folding / packing (outside the kernel).
    eye = jnp.eye(R, dtype=jnp.float32)
    W_blk = jnp.kron(eye, W * scale.reshape(F, 1))               # (R*F, R*D)
    S_sum = jnp.kron(eye, jnp.ones((F, F), jnp.float32))         # (R*F, R*F)
    b_blk = jnp.tile(b.reshape(1, D), (1, R))                    # (1, R*D)

    # VMEM budget: double-buffered in/out blocks + whole-array constants.
    vmem_bytes = (2 * tg * R * F * 4
                  + 2 * tg * R * D * 4
                  + (R * F) * (R * F) * 4
                  + (R * F) * (R * D) * 4
                  + 8 * R * D * 4)
    vmem_limit = min(64 * 1024 * 1024, 2 * vmem_bytes + 4 * 1024 * 1024)

    out = pl.pallas_call(
        _locate_encoder_kernel,
        out_shape=jax.ShapeDtypeStruct((G, R * D), jnp.float32),
        grid=(grid,),
        in_specs=[
            pl.BlockSpec((tg, R * F), lambda i: (i, 0)),
            pl.BlockSpec(memory_space=pltpu.MemorySpace.VMEM),   # S_sum (constant)
            pl.BlockSpec(memory_space=pltpu.MemorySpace.VMEM),   # W_blk (constant)
            pl.BlockSpec(memory_space=pltpu.MemorySpace.VMEM),   # b_blk (constant)
        ],
        out_specs=pl.BlockSpec((tg, R * D), lambda i: (i, 0)),
        compiler_params=pltpu.CompilerParams(
            dimension_semantics=("parallel",),
            vmem_limit_bytes=vmem_limit,
        ),
    )(xp, S_sum, W_blk, b_blk)

    return out.reshape(M_pad, D)[:M].reshape(B, N, D)


# ---------------------------------------------------------------------------
# Kernel 2: word_judge
#   softmax(relu(ctx @ W1 + b1) @ W2 + b2, axis=-1)   (Dropout identity in eval)
#   Pad-mask multiply happens outside the kernel on the tiny (B,T,4) output.
# ---------------------------------------------------------------------------
def _word_judge_kernel(ctx_ref, w1_ref, b1_ref, w2_ref, b2_ref, out_ref):
    x = ctx_ref[...]                                             # (tm, H)
    h = jnp.dot(x, w1_ref[...], preferred_element_type=jnp.float32) + b1_ref[...]
    h = jnp.maximum(h, 0.0)                                      # ReLU (f32)
    logits = (
        jnp.dot(h.astype(w2_ref.dtype), w2_ref[...],
                preferred_element_type=jnp.float32)
        + b2_ref[...]
    )                                                            # (tm, 4) f32
    m = jnp.max(logits, axis=-1, keepdims=True)
    e = jnp.exp(logits - m)
    s = jnp.sum(e, axis=-1, keepdims=True)
    inv = pl.reciprocal(s, approx=True)                          # EUP slot
    inv = inv * (2.0 - s * inv)                                  # one Newton step
    out_ref[...] = e * inv


def word_judge(context, is_not_pad, W1, b1, W2, b2, *, tm=4096,
               in_dtype=jnp.float32):
    # in_dtype=jnp.bfloat16 halves the dominant HBM read (main win on v5e);
    # MXU accumulates in f32 and the softmax stays f32 either way.
    B, T, H = context.shape
    Hh = W1.shape[1]
    C = W2.shape[1]
    M = B * T

    M_pad = _round_up(M, 8)               # pad only to sublane granularity
    ctx = context.reshape(M, H)
    if M_pad != M:
        ctx = jnp.pad(ctx, ((0, M_pad - M), (0, 0)))  # <8 zero rows, sliced off
    ctx = ctx.astype(in_dtype)
    W1c = W1.astype(in_dtype)
    W2c = W2.astype(in_dtype)
    b1c = b1.astype(jnp.float32)
    b2c = b2.astype(jnp.float32)

    # Row tile: multiple of 8, <= M_pad, capped so the parallel grid has >= 2
    # steps when possible (v7x: 2 TensorCores).
    tm = max(8, (min(tm, M_pad) // 8) * 8)
    tm = min(tm, max(8, _round_up(_ceil_div(M_pad, 2), 8)))
    grid = _ceil_div(M_pad, tm)           # ragged last block masked by Pallas

    # VMEM budget: out block is lane-padded to 128 in VMEM (C=4 -> 128).
    isz = jnp.dtype(in_dtype).itemsize
    out_lanes = _round_up(C, 128)
    hh_lanes = _round_up(Hh, 128)
    vmem_bytes = (2 * tm * H * isz
                  + 2 * tm * out_lanes * 4
                  + H * hh_lanes * isz + 8 * hh_lanes * 4
                  + Hh * out_lanes * isz + 8 * out_lanes * 4)
    vmem_limit = min(64 * 1024 * 1024, 2 * vmem_bytes + 4 * 1024 * 1024)

    probs = pl.pallas_call(
        _word_judge_kernel,
        out_shape=jax.ShapeDtypeStruct((M_pad, C), jnp.float32),
        grid=(grid,),
        in_specs=[
            pl.BlockSpec((tm, H), lambda i: (i, 0)),
            pl.BlockSpec(memory_space=pltpu.MemorySpace.VMEM),   # W1 (constant)
            pl.BlockSpec(memory_space=pltpu.MemorySpace.VMEM),   # b1 (constant)
            pl.BlockSpec(memory_space=pltpu.MemorySpace.VMEM),   # W2 (constant)
            pl.BlockSpec(memory_space=pltpu.MemorySpace.VMEM),   # b2 (constant)
        ],
        out_specs=pl.BlockSpec((tm, C), lambda i: (i, 0)),
        compiler_params=pltpu.CompilerParams(
            dimension_semantics=("parallel",),
            vmem_limit_bytes=vmem_limit,
        ),
    )(ctx, W1c, b1c, W2c, b2c)

    probs = probs[:M].reshape(B, T, C)
    # Pad-mask multiply (as in CR.forward) on the tiny output, outside the kernel.
    return probs * is_not_pad[..., None].astype(probs.dtype)


# ---------------------------------------------------------------------------
# Pure-JAX references (for correctness check)
# ---------------------------------------------------------------------------
def locate_encoder_ref(lfeat, scale, W, b):
    nrm = jnp.maximum(jnp.linalg.norm(lfeat, axis=-1, keepdims=True), 1e-12)
    xn = lfeat / nrm * scale
    return xn @ W + b


def word_judge_ref(context, is_not_pad, W1, b1, W2, b2):
    h = jnp.maximum(context @ W1 + b1, 0.0)
    logits = h @ W2 + b2
    p = jax.nn.softmax(logits, axis=-1)
    return p * is_not_pad[..., None]


if __name__ == "__main__":
    key = jax.random.PRNGKey(0)
    ks = jax.random.split(key, 10)

    # Small, CR-consistent dimensions
    B, N, T = 2, 8, 8                # batch, num boxes, (max) sentence length
    rnn_hidden, bidirectional = 16, True
    H = rnn_hidden * (2 if bidirectional else 1)   # dim_word_output = 32
    dim_hidden_word_judge = 32
    num_cls_word = 4
    dim_location = 32
    vis_init_norm = 20.0

    # ---- inputs ----
    lfeat = jax.random.normal(ks[0], (B, N, 5), dtype=jnp.float32)
    # Synthetic RNN context (RNNEncoder itself is not defined in the reference).
    context = jax.random.normal(ks[1], (B, T, H), dtype=jnp.float32)
    sents = jax.random.randint(ks[2], (B, T), 0, 10, dtype=jnp.int32)
    sents = sents.at[:, T - 2:].set(0)             # trailing pad tokens
    is_not_pad = (sents != 0).astype(jnp.float32)  # (B, T)

    # ---- deterministic parameters ----
    loc_scale = jnp.full((1, 5), vis_init_norm, dtype=jnp.float32)  # NormalizeScale weight
    loc_W = 0.1 * jax.random.normal(ks[3], (5, dim_location), dtype=jnp.float32)
    loc_b = 0.01 * jax.random.normal(ks[4], (1, dim_location), dtype=jnp.float32)
    wj_W1 = 0.1 * jax.random.normal(ks[5], (H, dim_hidden_word_judge), dtype=jnp.float32)
    wj_b1 = 0.01 * jax.random.normal(ks[6], (1, dim_hidden_word_judge), dtype=jnp.float32)
    wj_W2 = 0.1 * jax.random.normal(ks[7], (dim_hidden_word_judge, num_cls_word), dtype=jnp.float32)
    wj_b2 = 0.01 * jax.random.normal(ks[8], (1, num_cls_word), dtype=jnp.float32)

    # ---- Pallas kernels ----
    location_feature = locate_encoder(lfeat, loc_scale, loc_W, loc_b)
    context_weight = word_judge(context, is_not_pad, wj_W1, wj_b1, wj_W2, wj_b2)

    jax.block_until_ready((location_feature, context_weight))

    # ---- verify against pure-JAX references ----
    loc_ref = locate_encoder_ref(lfeat, loc_scale, loc_W, loc_b)
    wj_ref = word_judge_ref(context, is_not_pad, wj_W1, wj_b1, wj_W2, wj_b2)
    assert location_feature.shape == loc_ref.shape
    assert context_weight.shape == wj_ref.shape
    # 1e-4 tolerance: rsqrt / approx-reciprocal(+Newton) paths differ from the
    # reference at the ~1e-6 level; this remains a tight f32 check.
    assert jnp.allclose(location_feature, loc_ref, atol=1e-4, rtol=1e-4)
    assert jnp.allclose(context_weight, wj_ref, atol=1e-4, rtol=1e-4)

    # TODO(synk): self.controller / self.updater / self.matching calls of
    # CR.forward are omitted — their classes are not defined in the reference.
    print("KERNEL_OK")
</pallas_src>

<mosaic_0001>
module attributes {stable_mosaic.version = 11 : i64} {
  func.func @_locate_encoder_kernel(%arg0: i32, %arg1: memref<8x80xf32, #tpu.memory_space<vmem>>, %arg2: memref<80x80xf32, #tpu.memory_space<vmem>>, %arg3: memref<80x512xf32, #tpu.memory_space<vmem>>, %arg4: memref<1x512xf32, #tpu.memory_space<vmem>>, %arg5: memref<8x512xf32, #tpu.memory_space<vmem>>) attributes {dimension_semantics = [#tpu.dimension_semantics<parallel>], iteration_bounds = array<i64: 1>, scalar_prefetch = 0 : i64, scratch_operands = 0 : i64, tpu.core_type = #tpu.core_type<tc>, window_params = [{transform_indices = @transform_0, window_bounds = array<i64: 8, 80>}, {pipeline_mode = #tpu.pipeline_mode<synchronous>, transform_indices = @transform_1, window_bounds = array<i64: 80, 80>}, {pipeline_mode = #tpu.pipeline_mode<synchronous>, transform_indices = @transform_2, window_bounds = array<i64: 80, 512>}, {pipeline_mode = #tpu.pipeline_mode<synchronous>, transform_indices = @transform_3, window_bounds = array<i64: 1, 512>}, {transform_indices = @transform_4, window_bounds = array<i64: 8, 512>}]} {
    %c0 = arith.constant 0 : index
    %c0_0 = arith.constant 0 : index
    %0 = vector.load %arg1[%c0, %c0_0] : memref<8x80xf32, #tpu.memory_space<vmem>>, vector<8x80xf32>
    %1 = arith.mulf %0, %0 : vector<8x80xf32>
    %c0_1 = arith.constant 0 : index
    %c0_2 = arith.constant 0 : index
    %2 = vector.load %arg2[%c0_1, %c0_2] : memref<80x80xf32, #tpu.memory_space<vmem>>, vector<80x80xf32>
    %cst = arith.constant dense<0.000000e+00> : vector<8x80xf32>
    %3 = tpu.matmul %1, %2, %cst {dimension_numbers = #tpu.dot_dimension_numbers<[1], [0], [0], [1], [0, 0, 1, 1], [], []>} : vector<8x80xf32>, vector<80x80xf32>, vector<8x80xf32> -> vector<8x80xf32>
    %cst_3 = arith.constant 1.000000e-24 : f32
    %4 = vector.broadcast %cst_3 : f32 to vector<8x80xf32>
    %5 = arith.maximumf %3, %4 : vector<8x80xf32>
    %6 = math.rsqrt %5 : vector<8x80xf32>
    %7 = arith.mulf %0, %6 : vector<8x80xf32>
    %c0_4 = arith.constant 0 : index
    %c0_5 = arith.constant 0 : index
    %8 = vector.load %arg3[%c0_4, %c0_5] : memref<80x512xf32, #tpu.memory_space<vmem>>, vector<80x512xf32>
    %cst_6 = arith.constant dense<0.000000e+00> : vector<8x512xf32>
    %9 = tpu.matmul %7, %8, %cst_6 {dimension_numbers = #tpu.dot_dimension_numbers<[1], [0], [0], [1], [0, 0, 1, 1], [], []>} : vector<8x80xf32>, vector<80x512xf32>, vector<8x512xf32> -> vector<8x512xf32>
    %c0_7 = arith.constant 0 : index
    %c0_8 = arith.constant 0 : index
    %10 = vector.load %arg4[%c0_7, %c0_8] : memref<1x512xf32, #tpu.memory_space<vmem>>, vector<1x512xf32>
    %11 = vector.broadcast %10 : vector<1x512xf32> to vector<8x512xf32>
    %12 = arith.addf %9, %11 : vector<8x512xf32>
    %c0_9 = arith.constant 0 : index
    %c0_10 = arith.constant 0 : index
    %13 = vector.load %arg5[%c0_9, %c0_10] : memref<8x512xf32, #tpu.memory_space<vmem>>, vector<8x512xf32>
    tpu.vector_store %arg5[%c0_9, %c0_10], %12 {strides = array<i32>} : memref<8x512xf32, #tpu.memory_space<vmem>>, vector<8x512xf32>,
    return
  }
  func.func @transform_0(%arg0: i32) -> (i32, i32) {
    %c0_i32 = arith.constant 0 : i32
    %c0_i32_0 = arith.constant 0 : i32
    return %arg0, %c0_i32 : i32, i32
  }
  func.func @transform_1(%arg0: i32) -> (i32, i32) {
    %c0_i32 = arith.constant 0 : i32
    %c0_i32_0 = arith.constant 0 : i32
    %c0_i32_1 = arith.constant 0 : i32
    return %c0_i32, %c0_i32_0 : i32, i32
  }
  func.func @transform_2(%arg0: i32) -> (i32, i32) {
    %c0_i32 = arith.constant 0 : i32
    %c0_i32_0 = arith.constant 0 : i32
    %c0_i32_1 = arith.constant 0 : i32
    return %c0_i32, %c0_i32_0 : i32, i32
  }
  func.func @transform_3(%arg0: i32) -> (i32, i32) {
    %c0_i32 = arith.constant 0 : i32
    %c0_i32_0 = arith.constant 0 : i32
    %c0_i32_1 = arith.constant 0 : i32
    return %c0_i32, %c0_i32_0 : i32, i32
  }
  func.func @transform_4(%arg0: i32) -> (i32, i32) {
    %c0_i32 = arith.constant 0 : i32
    %c0_i32_0 = arith.constant 0 : i32
    return %arg0, %c0_i32 : i32, i32
  }
}

</mosaic_0001>

<bundles_post_ra>
// kernel: tpu_custom_call.1
= control target key start
LH: loop header
LB: loop body
LE: loop exit
PB: predicated region body
PF: predicated region fallthrough
CT: control target
= control target key end

     0   :  { %9 = vsyncpa [#allocation3], 0  ;;  %s667_s0 = inlined_call_operand.hbm [shape: f32[8,80], index: 0, kind: input, shape index: {}]   ;;  %s668_s1 = inlined_call_operand.hbm [shape: f32[80,80], index: 1, kind: input, shape index: {}]   ;;  %s669_s2 = inlined_call_operand.hbm [shape: f32[80,512], index: 2, kind: input, shape index: {}]   ;;  %s670_s3 = inlined_call_operand.vmem [shape: f32[1,512], index: 3, kind: input, shape index: {}]   ;;  %s671_s4 = inlined_call_operand.hbm [shape: f32[8,512], index: 4, kind: output, shape index: {}]  }
   0x1   :  { %10 = vsyncpa [#allocation6], 0 }
   0x2   :  { %11 = vsyncpa [#allocation4], 0  ;;  %s572_s15 = smov [#allocation5]   ;;  %s478_s19 = scalar_lea.hbm %s668_s1, 1280 }
   0x3   :  { %s27_s16 = sshll.u32 %s572_s15, 4  ;;  %p479_p0 = scmp.ne.s32.totalorder %s668_s1, %s478_s19  ;;  %s28_s16 = int_to_ptr.vmem [resolvable:$true] %s27_s16 }
   0x4   :  { %p482_p1 = scmp.lt.u32.totalorder %s478_s19, %s668_s1 }
   0x6   :  { %p484_p2 = pnand %p482_p1, %p479_p0 }
   0x8   :  { %487 = shalt.err (!%p484_p2)
}
   0x9   :  { %s488_s24 = scalar_lea.vmem %s28_s16, 1280  ;;  %p493_p4 = scmp.lt.s32.totalorder %s28_s16, %s28_s16 }
   0xa   :  { %p489_p3 = scmp.ne.s32.totalorder %s28_s16, %s488_s24  ;;  %p494_p5 = scmp.lt.s32.totalorder %s488_s24, %s488_s24 }
   0xc   :  { %p495_p6 = por %p494_p5, %p493_p4 }
   0xe   :  { %p496_p7 = pnand %p495_p6, %p489_p3 }
  0x10   :  { %499 = shalt.err (!%p496_p7)
}
  0x11   :  { %s573_s25 = smov 128   ;;  %s574_s26 = smov 8  }
  0x12   :  { %33 = dma.hbm_to_vmem [thread:$0]  %s668_s1, 1280, %s28_s16, [#allocation6], %s573_s25, %s573_s25, %s574_s26  }
  0x13   :  { %s575_s29 = smov [#allocation2]   ;;  %s576_s5 = smov [#allocation7]  }
  0x14   :  { %s18_s30 = sshll.u32 %s575_s29, 4  ;;  %s39_s6 = sshll.u32 %s576_s5, 4  ;;  %s19_s30 = int_to_ptr.vmem [resolvable:$true] %s18_s30  ;;  %s40_s6 = int_to_ptr.vmem [resolvable:$true] %s39_s6 }
  0x15   :  { %s500_s9 = scalar_lea.hbm %s667_s0, 128 }
  0x16   :  { %p501_p8 = scmp.ne.s32.totalorder %s667_s0, %s500_s9  ;;  %p504_p9 = scmp.lt.u32.totalorder %s500_s9, %s667_s0 }
  0x18   :  { %p506_p10 = pnand %p504_p9, %p501_p8 }
  0x1a   :  { %509 = shalt.err (!%p506_p10)
}
  0x1b   :  { %s510_s1 = scalar_lea.vmem %s19_s30, 128  ;;  %p515_p12 = scmp.lt.s32.totalorder %s19_s30, %s19_s30 }
  0x1c   :  { %p511_p11 = scmp.ne.s32.totalorder %s19_s30, %s510_s1  ;;  %p516_p13 = scmp.lt.s32.totalorder %s510_s1, %s510_s1 }
  0x1e   :  { %p517_p0 = por %p516_p13, %p515_p12 }
  0x20   :  { %p518_p1 = pnand %p517_p0, %p511_p11 }
  0x22   :  { %521 = shalt.err (!%p518_p1)
}
  0x23   :  { %21 = dma.hbm_to_vmem [thread:$0]  %s667_s0, 128, %s19_s30, [#allocation3]  }
  0x24   :  { %s522_s18 = scalar_lea.hbm %s669_s2, 5120 }
  0x25   :  { %p523_p2 = scmp.ne.s32.totalorder %s669_s2, %s522_s18  ;;  %p526_p3 = scmp.lt.u32.totalorder %s522_s18, %s669_s2 }
  0x27   :  { %p528_p4 = pnand %p526_p3, %p523_p2 }
  0x29   :  { %531 = shalt.err (!%p528_p4)
}
  0x2a   :  { %s532_s23 = scalar_lea.vmem %s40_s6, 5120  ;;  %p537_p6 = scmp.lt.s32.totalorder %s40_s6, %s40_s6 }
  0x2b   :  { %p533_p5 = scmp.ne.s32.totalorder %s40_s6, %s532_s23  ;;  %p538_p7 = scmp.lt.s32.totalorder %s532_s23, %s532_s23 }
  0x2d   :  { %p539_p8 = por %p538_p7, %p537_p6 }
  0x2f   :  { %p540_p9 = pnand %p539_p8, %p533_p5 }
  0x31   :  { %543 = shalt.err (!%p540_p9)
}
  0x32   :  { %s577_s0 = smov 512   ;;  %s578_s24 = smov 32  }
  0x33   :  { %45 = dma.hbm_to_vmem [thread:$0]  %s669_s2, 5120, %s40_s6, [#allocation6], %s577_s0, %s577_s0, %s578_s24  }
  0x34   :  { %566 = dma.done.wait [#allocation3], 128  }
  0x35   :  { %567 = vsyncadd [#allocation3], 4294967168 }
  0x36   :  { %568 = dma.done.wait [#allocation6], 6400  }
  0x37   :  { %569 = vsyncadd [#allocation6], 4294960896  ;;  %v579_v0 = vmov 0.0|0.0   ;;  %vm580_vm0 = vmmov 0   ;;  %v581_v1 = vmov 0.0   ;;  %v59_v2 = vld [vmem:[#allocation5] sm:$0xff] }
  0x38   :  { %410 = vmatprep.subr.bf16.mxu0 %v579_v0  ;;  %407 = vmatprep.mubr.msk.f32.mxu0 %vm580_vm0, %v581_v1  ;;  %v60_v3 = vld [vmem:[#allocation5 + $0x8] sm:$0xff]  ;;  %v61_v4 = vld [vmem:[#allocation5 + $0x10] sm:$0xff]  ;;  %v62_v6 = vld [vmem:[#allocation5 + $0x18] sm:$0xff]  ;;  %vm69_vm1 = vcmask 654336   ;;  %s582_s28 = smov [#allocation8]  }
  0x39   :  { %275 = vmatprep.mubr.f32.mxu1 %v581_v1  ;;  %v411_v5 = vpack.c.bf16 %v60_v3, %v59_v2  ;;  %v414_v7 = vpack.c.bf16 %v62_v6, %v61_v4  ;;  %v147_v8 = vld [vmem:[#allocation7 + $0x8] sm:$0xff]  ;;  %v63_v9 = vld [vmem:[#allocation5 + $0x20] sm:$0xff]  ;;  %v64_v10 = vld [vmem:[#allocation5 + $0x28] sm:$0xff]  ;;  %s363_s29 = sshll.u32 %s582_s28, 4  ;;  %s364_s29 = int_to_ptr.vmem [resolvable:$true] %s363_s29 }
  0x3a   :  { %v151_v11 = vld [vmem:[#allocation7 + $0x28] sm:$0xff]  ;;  %v146_v13 = vld [vmem:[#allocation7] sm:$0xff]  ;;  %v417_v16 = vpack.c.bf16 %v64_v10, %v63_v9  ;;  %v67_v20 = vld [vmem:[#allocation5 + $0x40] sm:$0xff]  ;;  %p549_p11 = scmp.lt.s32.totalorder %s364_s29, %s364_s29 }
  0x3b   :  { %412 = vmatpush3.bf16.msra.mxu0 %v411_v5  ;;  %v425_v12 = vpack.c.bf16 %v151_v11, %v147_v8  ;;  %v150_v14 = vld [vmem:[#allocation7 + $0x20] sm:$0xff]  ;;  %v66_v18 = vld [vmem:[#allocation5 + $0x38] sm:$0xff]  ;;  %v68_v21 = vld [vmem:[#allocation5 + $0x48] sm:$0xff] }
  0x3c   :  { %413 = vmatprep.subr.bf16.mxu0 %v579_v0  ;;  %v427_v15 = vpack.c.bf16 %v150_v14, %v146_v13  ;;  %v65_v17 = vld [vmem:[#allocation5 + $0x30] sm:$0xff]  ;;  %v149_v22 = vld [vmem:[#allocation7 + $0x18] sm:$0xff]  ;;  %v423_v24 = vpack.c.bf16 %v68_v21, %v67_v20  ;;  %v644_v25 = vld [vmem:[#allocation2] sm:$0xff]  ;;  %v188_v20 = vlaneseq }
  0x3d   :  { %426 = vmatprep.subr.bf16.mxu1 %v425_v12  ;;  %v420_v19 = vpack.c.bf16 %v66_v18, %v65_v17  ;;  %v153_v23 = vld [vmem:[#allocation7 + $0x38] sm:$0xff]  ;;  %v148_v27 = vld [vmem:[#allocation7 + $0x10] sm:$0xff]  ;;  %v58_v29 = vmul.f32 %v644_v25, %v644_v25  ;;  %v155_v31 = vld [vmem:[#allocation7 + $0x48] sm:$0xff] }
  0x3e   :  { %428 = vmatpush1.bf16.msra.mxu1 %v427_v15  ;;  %v445_v26 = vpack.c.bf16 %v153_v23, %v149_v22  ;;  %v152_v28 = vld [vmem:[#allocation7 + $0x30] sm:$0xff]  ;;  %v159_v32 = vld [vmem:[#allocation7 + $0x68] sm:$0xff]  ;;  %v157_v33 = vld [vmem:[#allocation7 + $0x58] sm:$0xff]  ;;  %v189_v21 = vshrl.u32 %v188_v20, 7 }
  0x3f   :  { %415 = vmatpush3.bf16.msra.mxu0 %v414_v7  ;;  %v447_v30 = vpack.c.bf16 %v152_v28, %v148_v27  ;;  %v429_v34 = vpack.c.bf16 %v159_v32, %v155_v31  ;;  %v161_v35 = vld [vmem:[#allocation7 + $0x78] sm:$0xff]  ;;  %v154_v36 = vld [vmem:[#allocation7 + $0x40] sm:$0xff]  ;;  %v156_v40 = vld [vmem:[#allocation7 + $0x50] sm:$0xff] }
  0x40   :  { %416 = vmatprep.subr.bf16.mxu0 %v579_v0  ;;  %v158_v37 = vld [vmem:[#allocation7 + $0x60] sm:$0xff]  ;;  %v449_v38 = vpack.c.bf16 %v161_v35, %v157_v33  ;;  %v160_v41 = vld [vmem:[#allocation7 + $0x70] sm:$0xff]  ;;  %v163_v43 = vld [vmem:[#allocation7 + $0x88] sm:$0xff]  ;;  %v190_v22 = vsub.s32 0, %v189_v21  ;;  %v198_v23 = vsub.s32 2, %v189_v21  ;;  %v202_v27 = vsub.s32 3, %v189_v21 }
  0x41   :  { %v431_v39 = vpack.c.bf16 %v158_v37, %v154_v36  ;;  %430 = vmatprep.subr.bf16.mxu1 %v429_v34  ;;  %v451_v42 = vpack.c.bf16 %v160_v41, %v156_v40  ;;  %v167_v44 = vld [vmem:[#allocation7 + $0xa8] sm:$0xff]  ;;  %v165_v45 = vld [vmem:[#allocation7 + $0x98] sm:$0xff]  ;;  %v162_v48 = vld [vmem:[#allocation7 + $0x80] sm:$0xff] }
  0x42   :  { %v433_v46 = vpack.c.bf16 %v167_v44, %v163_v43  ;;  %v169_v47 = vld [vmem:[#allocation7 + $0xb8] sm:$0xff]  ;;  %v166_v49 = vld [vmem:[#allocation7 + $0xa0] sm:$0xff]  ;;  %v164_v52 = vld [vmem:[#allocation7 + $0x90] sm:$0xff] }
  0x43   :  { %418 = vmatpush3.bf16.msra.mxu0 %v417_v16  ;;  %432 = vmatpush1.bf16.msra.mxu1 %v431_v39  ;;  %v453_v50 = vpack.c.bf16 %v169_v47, %v165_v45  ;;  %v435_v51 = vpack.c.bf16 %v166_v49, %v162_v48  ;;  %v168_v53 = vld [vmem:[#allocation7 + $0xb0] sm:$0xff]  ;;  %v171_v54 = vld [vmem:[#allocation7 + $0xc8] sm:$0xff]  ;;  %v173_v57 = vld [vmem:[#allocation7 + $0xd8] sm:$0xff] }
  0x44   :  { %419 = vmatprep.subr.bf16.mxu0 %v579_v0  ;;  %434 = vmatprep.subr.bf16.mxu1 %v433_v46  ;;  %v455_v55 = vpack.c.bf16 %v168_v53, %v164_v52  ;;  %v175_v56 = vld [vmem:[#allocation7 + $0xe8] sm:$0xff]  ;;  %v177_v58 = vld [vmem:[#allocation7 + $0xf8] sm:$0xff]  ;;  %v170_v61 = vld [vmem:[#allocation7 + $0xc0] sm:$0xff] }
  0x45   :  { %v437_v59 = vpack.c.bf16 %v175_v56, %v171_v54  ;;  %v457_v60 = vpack.c.bf16 %v177_v58, %v173_v57  ;;  %v174_v62 = vld [vmem:[#allocation7 + $0xe0] sm:$0xff]  ;;  %v172_v63 = vld [vmem:[#allocation7 + $0xd0] sm:$0xff]  ;;  %v179_v2 = vld [vmem:[#allocation7 + $0x108] sm:$0xff] }
  0x46   :  { %v183_v3 = vld [vmem:[#allocation7 + $0x128] sm:$0xff]  ;;  %v181_v6 = vld [vmem:[#allocation7 + $0x118] sm:$0xff]  ;;  %v178_v8 = vld [vmem:[#allocation7 + $0x100] sm:$0xff] }
  0x47   :  { %421 = vmatpush3.bf16.msra.mxu0 %v420_v19  ;;  %436 = vmatpush1.bf16.msra.mxu1 %v435_v51  ;;  %v441_v5 = vpack.c.bf16 %v183_v3, %v179_v2  ;;  %v185_v7 = vld [vmem:[#allocation7 + $0x138] sm:$0xff]  ;;  %v182_v10 = vld [vmem:[#allocation7 + $0x120] sm:$0xff]  ;;  %v180_v11 = vld [vmem:[#allocation7 + $0x110] sm:$0xff] }
  0x48   :  { %422 = vmatprep.subr.bf16.mxu0 %v579_v0  ;;  %v439_v0 = vpack.c.bf16 %v174_v62, %v170_v61  ;;  %438 = vmatprep.subr.bf16.mxu1 %v437_v59  ;;  %v461_v9 = vpack.c.bf16 %v185_v7, %v181_v6  ;;  %v184_v12 = vld [vmem:[#allocation7 + $0x130] sm:$0xff]  ;;  %v443_v13 = vpack.c.bf16 %v182_v10, %v178_v8 }
  0x49   :  { %v463_v14 = vpack.c.bf16 %v184_v12, %v180_v11 }
  0x4b   :  { %424 = vmatpush3.bf16.msra.mxu0 %v423_v24  ;;  %440 = vmatpush1.bf16.msra.mxu1 %v439_v0  ;;  %v186_v24 = vld [vmem:[%s670_s3] sm:$0xf]  ;;  %s544_s3 = scalar_lea.vmem %s364_s29, 512 }
  0x4c   :  { %446 = vmatprep.subr.bf16.mxu0 %v445_v26  ;;  %442 = vmatprep.subr.bf16.mxu1 %v441_v5  ;;  %v194_v26 = vsub.s32 1, %v189_v21  ;;  %v191_v28 = vrot.slane %v186_v24, %v190_v22  ;;  %v203_v31 = vrot.slane %v186_v24, %v202_v27  ;;  %p545_p10 = scmp.ne.s32.totalorder %s364_s29, %s544_s3  ;;  %p550_p12 = scmp.lt.s32.totalorder %s544_s3, %s544_s3 }
  0x4e   :  { %408 = vmatmul.mubr.msk.f32.vlgmr.msra.gmra.mrb[0].mxu0 %vm69_vm1, %v58_v29  ;;  %v199_v29 = vrot.slane %v186_v24, %v198_v23  ;;  %p551_p13 = por %p550_p12, %p549_p11 }
  0x4f   :  { %448 = vmatpush1.bf16.msra.mxu0 %v447_v30  ;;  %346 = vmatprep.mubr.f32.mxu0 %v581_v1  ;;  %v176_v1 = vld [vmem:[#allocation7 + $0xf0] sm:$0xff]  ;;  %v195_v30 = vrot.slane %v186_v24, %v194_v26 }
  0x50   :  { %450 = vmatprep.subr.bf16.mxu0 %v449_v38  ;;  %v459_v4 = vpack.c.bf16 %v176_v1, %v172_v63  ;;  %444 = vmatpush1.bf16.msra.mxu1 %v443_v13  ;;  %p552_p0 = pnand %p551_p13, %p545_p10 }
  0x53   :  { %452 = vmatpush1.bf16.msra.mxu0 %v451_v42 }
  0x54   :  { %454 = vmatprep.subr.bf16.mxu0 %v453_v50 }
  0x57   :  { %456 = vmatpush1.bf16.msra.mxu0 %v455_v55 }
  0x58   :  { %458 = vmatprep.subr.bf16.mxu0 %v457_v60 }
  0x5b   :  { %460 = vmatpush1.bf16.msra.mxu0 %v459_v4 }
  0x5c   :  { %462 = vmatprep.subr.bf16.mxu0 %v461_v9 }
  0x5f   :  { %464 = vmatpush1.bf16.msra.mxu0 %v463_v14 }
 0x121   :  { %v139_v15 = vpop.f32.mrb[0].mxu0 }
 0x122   :  { %v143_v16 = vmax.f32 %v139_v15, 1e-24  ;;  %v409_v17 = vpop.f32.mrb[1].mxu0 }
 0x124   :  { %476 = vrsqrt.f32 %v143_v16 }
 0x12e   :  { %v477_v18 = vpop.eup %476 }
 0x12f   :  { %v145_v19 = vmul.f32 %v477_v18, %v644_v25 }
 0x131   :  { %374 = vmatmul.mubr.msk.f32.vlgmr.msra.gmra.mrb[0].mxu1 %vm69_vm1, %v145_v19  ;;  %375 = vmatmul.mubr.msk.f32.vlgmr.msra.gmra.mrb[2].mxu0 %vm69_vm1, %v145_v19 }
 0x204   :  { %v277_v25 = vpop.f32.mrb[0].mxu1  ;;  %v348_v32 = vpop.f32.mrb[2].mxu0 }
 0x205   :  { %v278_v33 = vadd.f32 %v277_v25, %v191_v28  ;;  %v349_v34 = vadd.f32 %v348_v32, %v199_v29  ;;  %v279_v35 = vpop.f32.mrb[1].mxu1  ;;  %v350_v36 = vpop.f32.mrb[3].mxu0 }
 0x206   :  { %v280_v37 = vadd.f32 %v279_v35, %v195_v30  ;;  %v351_v38 = vadd.f32 %v350_v36, %v203_v31 }
 0x207   :  { %353 = vst [vmem:[#allocation8] sm:$0xff] %v278_v33  ;;  %355 = vst [vmem:[#allocation8 + $0x10] sm:$0xff] %v349_v34 }
 0x208   :  { %354 = vst [vmem:[#allocation8 + $0x8] sm:$0xff] %v280_v37  ;;  %356 = vst [vmem:[#allocation8 + $0x18] sm:$0xff] %v351_v38 }
 0x209   :  { %555 = shalt.err (!%p552_p0)
}
 0x20a   :  { %s556_s6 = scalar_lea.hbm %s671_s4, 512 }
 0x20b   :  { %p557_p1 = scmp.ne.s32.totalorder %s671_s4, %s556_s6  ;;  %p560_p2 = scmp.lt.u32.totalorder %s556_s6, %s671_s4 }
 0x20d   :  { %p562_p3 = pnand %p560_p2, %p557_p1 }
 0x20f   :  { %565 = shalt.err (!%p562_p3)
}
 0x210   :  { %366 = dma.vmem_to_hbm [thread:$0]  %s364_s29, 512, %s671_s4, [#allocation4]  }
 0x211   :  { %570 = dma.done.wait [#allocation4], 512  }
 0x212   :  { %571 = vsyncadd [#allocation4], 4294966784 }
 0x213   :  { %370 = vsyncpa [#allocation3], 1 }
 0x214   :  { %371 = vsyncpa [#allocation6], 1 }
 0x215   :  { %372 = vsyncpa [#allocation4], 1 }

</bundles_post_ra>
